<compile_context>
chip_gen: v6e
topology: v6e:2x2x1
jax: 0.10.0
libtpu: 0.0.40
codegen_flags: <defaults>
</compile_context>

<pallas_src>
import functools

import jax
import jax.numpy as jnp
from jax.experimental import pallas as pl
from jax.experimental.pallas import tpu as pltpu


def _round_up(n: int, m: int) -> int:
    return ((n + m - 1) // m) * m


_MAX_TILE_B = 131072   # ~30 MiB VMEM footprint incl. double-buffering + temps
_MIN_TILE_B = 8192     # below this, per-grid-step overhead starts to dominate


def _pick_tile_b(b_pad: int) -> int:
    """Largest overhead-amortizing tile; prefer >=2 grid steps for v7x."""
    tile = min(_MAX_TILE_B, b_pad)
    if b_pad <= _MAX_TILE_B and b_pad >= 2 * _MIN_TILE_B:
        # Split into (at least) two steps so both v7x TensorCores get work,
        # but never shrink the tile below the overhead-amortizing minimum.
        tile = _round_up((b_pad + 1) // 2, 128)
    return tile


def _vmem_limit_bytes(tile_b: int) -> int:
    tile_bytes = 8 * tile_b * 4                 # one (8, tile_b) f32 tile
    # in + out tiles double-buffered (4x) plus live intermediates (x copy,
    # hidden, pre-sigmoid y ~ 3x) plus weights / compiler temps slack.
    return max(4 << 20, 7 * tile_bytes + (2 << 20))


def _autoencoder_kernel(x_ref, w1_ref, b1_ref, w2_ref, b2_ref, o_ref):
    x = x_ref[...]                                                # (8, TB) f32
    # Encoder: Linear(8 -> 3) + ReLU.   W1 is (3, 8), b1 is (3, 1).
    h = jnp.dot(w1_ref[...], x, preferred_element_type=jnp.float32) + b1_ref[...]
    h = jnp.maximum(h, 0.0)                                       # (3, TB)
    # Decoder: Linear(3 -> 8) + Sigmoid. W2 is (8, 3), b2 is (8, 1).
    y = jnp.dot(w2_ref[...], h, preferred_element_type=jnp.float32) + b2_ref[...]
    # sigmoid(y) == 0.5 * tanh(0.5 * y) + 0.5 : stays on the EUP slot.
    o_ref[...] = 0.5 * jnp.tanh(0.5 * y) + 0.5                    # (8, TB)


@functools.partial(jax.jit, static_argnames=("tile_b",))
def autoencoder_forward_fm(x_fm, w1, b1, w2, b2, *, tile_b: int | None = None):
    """Feature-major forward pass (preferred: no transposes touch HBM).

    x_fm: (8, B) float32  -- features on the sublane axis, batch on lanes
    w1: (3, 8), b1: (3,)   nn.Linear(8, 3) native (out, in) layout
    w2: (8, 3), b2: (8,)   nn.Linear(3, 8) native (out, in) layout
    returns (8, B) float32
    """
    din, B = x_fm.shape
    assert din == 8 and w1.shape == (3, 8) and w2.shape == (8, 3)

    # Pad batch (lane axis) only to a multiple of 128 -- NOT to a whole tile.
    b_pad = _round_up(max(B, 1), 128)
    if tile_b is None:
        tile_b = _pick_tile_b(b_pad)
    else:
        assert tile_b % 128 == 0, "tile_b must be a multiple of 128 lanes"
    n_tiles = pl.cdiv(b_pad, tile_b)

    x_t = x_fm.astype(jnp.float32)
    if b_pad != B:
        x_t = jnp.pad(x_t, ((0, 0), (0, b_pad - B)))
    b1c = b1.reshape(3, 1).astype(jnp.float32)
    b2c = b2.reshape(8, 1).astype(jnp.float32)

    cost = pl.CostEstimate(
        flops=2 * b_pad * (8 * 3 + 3 * 8),
        transcendentals=b_pad * 8,
        bytes_accessed=2 * b_pad * 8 * 4 + (3 * 8 + 3 + 8 * 3 + 8) * 4,
    )

    out_t = pl.pallas_call(
        _autoencoder_kernel,
        out_shape=jax.ShapeDtypeStruct((8, b_pad), jnp.float32),
        grid=(n_tiles,),
        in_specs=[
            pl.BlockSpec((8, tile_b), lambda i: (0, i)),   # x tile (pipelined)
            pl.BlockSpec((3, 8), lambda i: (0, 0)),        # W1 (resident)
            pl.BlockSpec((3, 1), lambda i: (0, 0)),        # b1
            pl.BlockSpec((8, 3), lambda i: (0, 0)),        # W2
            pl.BlockSpec((8, 1), lambda i: (0, 0)),        # b2
        ],
        out_specs=pl.BlockSpec((8, tile_b), lambda i: (0, i)),
        compiler_params=pltpu.CompilerParams(
            dimension_semantics=("parallel",),
            vmem_limit_bytes=_vmem_limit_bytes(tile_b),
        ),
        cost_estimate=cost,
    )(x_t, w1.astype(jnp.float32), b1c, w2.astype(jnp.float32), b2c)

    return out_t[:, :B]


@functools.partial(jax.jit, static_argnames=("tile_b",))
def autoencoder_forward(x, w1, b1, w2, b2, *, tile_b: int | None = None):
    """PyTorch-layout forward pass: x is (B, 8), returns (B, 8).

    NOTE: this compatibility wrapper pays two XLA transpose passes; for best
    end-to-end bandwidth keep activations feature-major and call
    autoencoder_forward_fm directly.
    """
    B, din = x.shape
    assert din == 8
    out_fm = autoencoder_forward_fm(x.astype(jnp.float32).T, w1, b1, w2, b2,
                                    tile_b=tile_b)
    return out_fm.T


def init_params(key):
    """PyTorch nn.Linear-style init, native (out, in) weight layout."""
    k1, k2, k3, k4 = jax.random.split(key, 4)
    lim1 = 1.0 / jnp.sqrt(8.0)   # fan_in = 8 for encoder
    lim2 = 1.0 / jnp.sqrt(3.0)   # fan_in = 3 for decoder
    w1 = jax.random.uniform(k1, (3, 8), jnp.float32, -lim1, lim1)
    b1 = jax.random.uniform(k2, (3,), jnp.float32, -lim1, lim1)
    w2 = jax.random.uniform(k3, (8, 3), jnp.float32, -lim2, lim2)
    b2 = jax.random.uniform(k4, (8,), jnp.float32, -lim2, lim2)
    return w1, b1, w2, b2


def _reference(x, w1, b1, w2, b2):
    h = jnp.maximum(x @ w1.T + b1, 0.0)
    return jax.nn.sigmoid(h @ w2.T + b2)


if __name__ == "__main__":
    key = jax.random.PRNGKey(0)
    kx, kp, kx2, kx3 = jax.random.split(key, 4)
    w1, b1, w2, b2 = init_params(kp)

    # 1) Spec-sized input (batch=2, features=8), PyTorch layout.
    B = 2
    x = jax.random.normal(kx, (B, 8), dtype=jnp.float32)
    out = jax.block_until_ready(autoencoder_forward(x, w1, b1, w2, b2))
    ref = _reference(x, w1, b1, w2, b2)
    assert out.shape == (B, 8)
    assert jnp.allclose(out, ref, atol=1e-5, rtol=1e-5)

    # 2) Non-multiple batch with a small user tile: exercises padding to 128
    #    and a 3-step pipelined "parallel" grid.
    B2 = 300
    x2 = jax.random.normal(kx2, (B2, 8), dtype=jnp.float32)
    out2 = jax.block_until_ready(
        autoencoder_forward(x2, w1, b1, w2, b2, tile_b=128))
    ref2 = _reference(x2, w1, b1, w2, b2)
    assert out2.shape == (B2, 8)
    assert jnp.allclose(out2, ref2, atol=1e-5, rtol=1e-5)

    # 3) Feature-major entry point (no wrapper transposes) on a larger batch:
    #    default tile selection gives a 2-step grid with a partial last block.
    B3 = 33000
    x3 = jax.random.normal(kx3, (B3, 8), dtype=jnp.float32)
    out3_fm = jax.block_until_ready(
        autoencoder_forward_fm(x3.T, w1, b1, w2, b2))
    ref3 = _reference(x3, w1, b1, w2, b2)
    assert out3_fm.shape == (8, B3)
    assert jnp.allclose(out3_fm.T, ref3, atol=1e-5, rtol=1e-5)

    print("KERNEL_OK")
</pallas_src>

<mosaic_0001>
module attributes {stable_mosaic.version = 11 : i64} {
  func.func @_autoencoder_kernel(%arg0: i32, %arg1: memref<8x128xf32, #tpu.memory_space<vmem>>, %arg2: memref<3x8xf32, #tpu.memory_space<vmem>>, %arg3: memref<3x1xf32, #tpu.memory_space<vmem>>, %arg4: memref<8x3xf32, #tpu.memory_space<vmem>>, %arg5: memref<8x1xf32, #tpu.memory_space<vmem>>, %arg6: memref<8x128xf32, #tpu.memory_space<vmem>>) attributes {dimension_semantics = [#tpu.dimension_semantics<parallel>], iteration_bounds = array<i64: 1>, scalar_prefetch = 0 : i64, scratch_operands = 0 : i64, tpu.core_type = #tpu.core_type<tc>, window_params = [{transform_indices = @transform_0, window_bounds = array<i64: 8, 128>}, {pipeline_mode = #tpu.pipeline_mode<synchronous>, transform_indices = @transform_1, window_bounds = array<i64: 3, 8>}, {pipeline_mode = #tpu.pipeline_mode<synchronous>, transform_indices = @transform_2, window_bounds = array<i64: 3, 1>}, {pipeline_mode = #tpu.pipeline_mode<synchronous>, transform_indices = @transform_3, window_bounds = array<i64: 8, 3>}, {pipeline_mode = #tpu.pipeline_mode<synchronous>, transform_indices = @transform_4, window_bounds = array<i64: 8, 1>}, {transform_indices = @transform_5, window_bounds = array<i64: 8, 128>}]} {
    %c0 = arith.constant 0 : index
    %c0_0 = arith.constant 0 : index
    %0 = vector.load %arg1[%c0, %c0_0] : memref<8x128xf32, #tpu.memory_space<vmem>>, vector<8x128xf32>
    %c0_1 = arith.constant 0 : index
    %c0_2 = arith.constant 0 : index
    %1 = vector.load %arg2[%c0_1, %c0_2] : memref<3x8xf32, #tpu.memory_space<vmem>>, vector<3x8xf32>
    %cst = arith.constant dense<0.000000e+00> : vector<3x128xf32>
    %2 = tpu.matmul %1, %0, %cst {dimension_numbers = #tpu.dot_dimension_numbers<[1], [0], [0], [1], [0, 0, 1, 1], [], []>} : vector<3x8xf32>, vector<8x128xf32>, vector<3x128xf32> -> vector<3x128xf32>
    %c0_3 = arith.constant 0 : index
    %c0_4 = arith.constant 0 : index
    %3 = vector.load %arg3[%c0_3, %c0_4] : memref<3x1xf32, #tpu.memory_space<vmem>>, vector<3x1xf32>
    %4 = vector.broadcast %3 : vector<3x1xf32> to vector<3x128xf32>
    %5 = arith.addf %2, %4 : vector<3x128xf32>
    %cst_5 = arith.constant 0.000000e+00 : f32
    %6 = vector.broadcast %cst_5 : f32 to vector<3x128xf32>
    %7 = arith.maximumf %5, %6 : vector<3x128xf32>
    %c0_6 = arith.constant 0 : index
    %c0_7 = arith.constant 0 : index
    %8 = vector.load %arg4[%c0_6, %c0_7] : memref<8x3xf32, #tpu.memory_space<vmem>>, vector<8x3xf32>
    %cst_8 = arith.constant dense<0.000000e+00> : vector<8x128xf32>
    %9 = tpu.matmul %8, %7, %cst_8 {dimension_numbers = #tpu.dot_dimension_numbers<[1], [0], [0], [1], [0, 0, 1, 1], [], []>} : vector<8x3xf32>, vector<3x128xf32>, vector<8x128xf32> -> vector<8x128xf32>
    %c0_9 = arith.constant 0 : index
    %c0_10 = arith.constant 0 : index
    %10 = vector.load %arg5[%c0_9, %c0_10] : memref<8x1xf32, #tpu.memory_space<vmem>>, vector<8x1xf32>
    %11 = vector.broadcast %10 : vector<8x1xf32> to vector<8x128xf32>
    %12 = arith.addf %9, %11 : vector<8x128xf32>
    %cst_11 = arith.constant 5.000000e-01 : f32
    %13 = vector.broadcast %cst_11 : f32 to vector<8x128xf32>
    %14 = arith.mulf %13, %12 : vector<8x128xf32>
    %15 = math.tanh %14 : vector<8x128xf32>
    %cst_12 = arith.constant 5.000000e-01 : f32
    %16 = vector.broadcast %cst_12 : f32 to vector<8x128xf32>
    %17 = arith.mulf %16, %15 : vector<8x128xf32>
    %cst_13 = arith.constant 5.000000e-01 : f32
    %18 = vector.broadcast %cst_13 : f32 to vector<8x128xf32>
    %19 = arith.addf %17, %18 : vector<8x128xf32>
    %c0_14 = arith.constant 0 : index
    %c0_15 = arith.constant 0 : index
    %20 = vector.load %arg6[%c0_14, %c0_15] : memref<8x128xf32, #tpu.memory_space<vmem>>, vector<8x128xf32>
    tpu.vector_store %arg6[%c0_14, %c0_15], %19 {strides = array<i32>} : memref<8x128xf32, #tpu.memory_space<vmem>>, vector<8x128xf32>,
    return
  }
  func.func @transform_0(%arg0: i32) -> (i32, i32) {
    %c0_i32 = arith.constant 0 : i32
    %c0_i32_0 = arith.constant 0 : i32
    return %c0_i32, %arg0 : i32, i32
  }
  func.func @transform_1(%arg0: i32) -> (i32, i32) {
    %c0_i32 = arith.constant 0 : i32
    %c0_i32_0 = arith.constant 0 : i32
    %c0_i32_1 = arith.constant 0 : i32
    return %c0_i32, %c0_i32_0 : i32, i32
  }
  func.func @transform_2(%arg0: i32) -> (i32, i32) {
    %c0_i32 = arith.constant 0 : i32
    %c0_i32_0 = arith.constant 0 : i32
    %c0_i32_1 = arith.constant 0 : i32
    return %c0_i32, %c0_i32_0 : i32, i32
  }
  func.func @transform_3(%arg0: i32) -> (i32, i32) {
    %c0_i32 = arith.constant 0 : i32
    %c0_i32_0 = arith.constant 0 : i32
    %c0_i32_1 = arith.constant 0 : i32
    return %c0_i32, %c0_i32_0 : i32, i32
  }
  func.func @transform_4(%arg0: i32) -> (i32, i32) {
    %c0_i32 = arith.constant 0 : i32
    %c0_i32_0 = arith.constant 0 : i32
    %c0_i32_1 = arith.constant 0 : i32
    return %c0_i32, %c0_i32_0 : i32, i32
  }
  func.func @transform_5(%arg0: i32) -> (i32, i32) {
    %c0_i32 = arith.constant 0 : i32
    %c0_i32_0 = arith.constant 0 : i32
    return %c0_i32, %arg0 : i32, i32
  }
}

</mosaic_0001>

<bundles_post_ra>
// kernel: autoencoder_forward_fm.1
= control target key start
LH: loop header
LB: loop body
LE: loop exit
PB: predicated region body
PF: predicated region fallthrough
CT: control target
= control target key end

     0   :  { %vm28_vm0 = vcmask 64512   ;;  %v220_v0 = vmov 0.0   ;;  %vm221_vm1 = vmmov 0   ;;  %v222_v4 = vmov 0   ;;  %s271_s0 = inlined_call_operand.vmem [shape: f32[8,128], index: 0, kind: input, shape index: {}]   ;;  %s272_s1 = inlined_call_operand.vmem [shape: f32[3,8], index: 1, kind: input, shape index: {}]   ;;  %s273_s2 = inlined_call_operand.vmem [shape: f32[3,1], index: 2, kind: input, shape index: {}]   ;;  %s274_s4 = inlined_call_operand.vmem [shape: f32[8,1], index: 4, kind: input, shape index: {}]   ;;  %s275_s3 = inlined_call_operand.vmem [shape: f32[8,3], index: 3, kind: input, shape index: {}]   ;;  %s276_s5 = inlined_call_operand.vmem [shape: f32[8,128], index: 5, kind: output, shape index: {}]  }
   0x1   :  { %204 = vmatprep.subr.mxu0 %v220_v0  ;;  %v20_v1 = vld [vmem:[%s271_s0] sm:$0xff]  ;;  %206 = vmatprep.mubr.msk.f32.mxu0 %vm221_vm1, %v220_v0  ;;  %vm114_vm2 = vcmask 1042432   ;;  %vm110_vm3 = vcmask 23552  }
   0x2   :  { %v21_v2 = vld [vmem:[%s272_s1] sm:$0x7]  ;;  %205 = vmatpush3.msra.mxu0 %v20_v1  ;;  %217 = vset.pattern.permute.xlu0 %v222_v4 }
   0x3   :  { %v22_v3 = vld [vmem:[%s273_s2] sm:$0x7]  ;;  %207 = vmatmul.mubr.msk.f32.vlgmr.msra.gmra.mxu0 %vm28_vm0, %v21_v2  ;;  %209 = vmatprep.subr.mxu1 %v220_v0 }
   0x4   :  { %25 = vperm.xlu0 %217, %v22_v3   ;;  %v104_v5 = vld [vmem:[%s274_s4] sm:$0xff]  ;;  %211 = vmatprep.mubr.msk.f32.mxu1 %vm221_vm1, %v220_v0 }
   0x5   :  { %v103_v11 = vld [vmem:[%s275_s3] sm:$0xff] }
   0x8   :  { %107 = vperm.xlu0 %217, %v104_v5  }
  0x7f   :  { %v26_v6 = vpop.permute.xlu0 %25 }
  0x83   :  { %v108_v12 = vpop.permute.xlu0 %107 }
  0xc3   :  { %v98_v7 = vpop.f32.mrf.mxu0 }
  0xc4   :  { %v99_v8 = vadd.f32 %v98_v7, %v26_v6 }
  0xc5   :  { %v208_v9 = vpop.f32.mrf.mxu0 }
  0xc6   :  { %v102_v10 = vmax.f32 %v99_v8, 0.0 }
  0xc8   :  { %210 = vmatpush3.msk.msra.mxu1 %vm114_vm2, %v102_v10 }
  0xc9   :  { %212 = vmatmul.mubr.msk.f32.vlgmr.msra.gmra.mxu1 %vm110_vm3, %v103_v11 }
 0x189   :  { %v184_v13 = vpop.f32.mrf.mxu1 }
 0x18a   :  { %v185_v14 = vadd.f32 %v184_v13, %v108_v12 }
 0x18b   :  { %v213_v15 = vpop.f32.mrf.mxu1 }
 0x18c   :  { %v188_v16 = vmul.f32 0.5, %v185_v14 }
 0x18e   :  { %218 = vtanh.f32 %v188_v16 }
 0x19b   :  { %v219_v17 = vpop.eup %218 }
 0x19c   :  { %v190_v18 = vmul.f32 0.5, %v219_v17 }
 0x19e   :  { %v191_v19 = vadd.f32 0.5, %v190_v18 }
 0x1a0   :  { %192 = vst [vmem:[%s276_s5] sm:$0xff] %v191_v19 }

</bundles_post_ra>
